<compile_context>
chip_gen: v7x
topology: tpu7x:2x2x1
jax: 0.10.0
libtpu: 0.0.40
codegen_flags: <defaults>
</compile_context>

<pallas_src>
import numpy as np
import jax
import jax.numpy as jnp
from jax.experimental import pallas as pl
from jax.experimental.pallas import tpu as pltpu


def _round_up(x, m):
    return ((x + m - 1) // m) * m


def _default_batch_tile():
    # v6e / v7x MXUs are 256 wide -> 256-row LHS tiles fill them.  v5e's MXU is
    # 128 wide and has the tightest scoped VMEM, so stay at 128 there.
    try:
        kind = jax.devices()[0].device_kind.lower()
    except Exception:
        return 128
    if "v5 lite" in kind or "v5lite" in kind or "v5e" in kind:
        return 128
    return 256


def torus_rep_kernel(t_ref, w_ref, crt_ref, cit_ref, or_ref, oi_ref):
    # t_ref: (tb, 1) f32; w_ref: (1, Kp) f32; crt/cit: (Kp, Np) bf16;
    # outputs: (tb, Np) f32.
    theta = t_ref[...] * w_ref[...]                   # (tb, Kp) phase
    # Padded frequency columns give cos(0)=1 / sin(0)=0.  This is harmless
    # ONLY because the corresponding rows of CrT/CiT are zero-padded in the
    # wrapper -- keep that invariant in sync if the padding changes.
    er = jnp.cos(theta).astype(jnp.bfloat16)
    ei = jnp.sin(theta).astype(jnp.bfloat16)
    crt = crt_ref[...]
    cit = cit_ref[...]

    def mm(a, b):
        # bf16 operands, f32 accumulation on the MXU (single pass).
        return jnp.dot(a, b, preferred_element_type=jnp.float32)

    # Plain 4-multiply complex matmul: (er + i*ei) @ (Cr + i*Ci)^T.
    # (Gauss 3-multiply trick intentionally NOT used: its imag path p3-p1-p2
    # is cancellation-prone with bf16 operands and needs a third weight mat.)
    or_ref[...] = mm(er, crt) - mm(ei, cit)           # real part
    oi_ref[...] = mm(er, cit) + mm(ei, crt)           # imag part


def torus_rep_forward(t, A, B, omega, x0, period=1.0, *, batch_tile=None):
    """t: scalar or (batch, 1) real; A, B: (N, N) complex; omega: (m,) int;
    x0: (N,) complex.  Returns (batch, N) complex64 (JAX array)."""
    A = np.asarray(A, np.complex128)
    B = np.asarray(B, np.complex128)
    x0 = np.asarray(x0, np.complex128)
    omega = np.asarray(omega, np.float64)

    N = x0.shape[0]
    m = omega.shape[0]
    if m < N:  # zero-pad frequencies like the PyTorch __init__
        omega = np.concatenate([omega, np.zeros(N - m)])

    # Fold the batch-independent B @ x0 into A (once, in float64).
    y = B @ x0                        # (N,)
    C = A * y[None, :]                # (N, N)

    # Pad only the lane/output dim to 128 (lane-dense stores); pad the
    # contraction dim only to a multiple of 8.
    Kp = _round_up(N, 8)
    Np = _round_up(N, 128)
    CrT = np.zeros((Kp, Np), np.float32); CrT[:N, :N] = np.real(C).T
    CiT = np.zeros((Kp, Np), np.float32); CiT[:N, :N] = np.imag(C).T

    w = np.zeros((1, Kp), np.float32)
    # NOTE: omega is materialized in f32; |omega| approaching 2^24 (or very
    # large t*omega products) would lose phase accuracy despite the f64
    # range reduction of t below.
    w[0, :N] = (2.0 * np.pi / float(period)) * omega

    # Range-reduce t mod period in float64 before dropping to f32 (omega is an
    # integer vector, so the phase factors are periodic in t).
    t = np.asarray(t, np.float64).reshape(-1, 1)
    t = np.fmod(t, float(period))
    batch = t.shape[0]

    if batch_tile is None:
        batch_tile = _default_batch_tile()
    if batch_tile <= 0 or batch_tile % 8 != 0:
        raise ValueError(f"batch_tile must be a positive multiple of 8, got {batch_tile}")
    tb = min(batch_tile, _round_up(batch, 8))
    batch_pad = _round_up(batch, tb)
    t_pad = np.zeros((batch_pad, 1), np.float32)
    t_pad[:batch, 0] = t[:, 0]

    t_dev = jnp.asarray(t_pad)
    w_dev = jnp.asarray(w)
    # bf16 weights: DEFAULT precision demotes MXU operands to bf16 anyway, so
    # this is accuracy-neutral but halves weight VMEM residency / DMA bytes.
    crt = jnp.asarray(CrT, dtype=jnp.bfloat16)
    cit = jnp.asarray(CiT, dtype=jnp.bfloat16)

    grid = (batch_pad // tb,)
    const = lambda i: (0, 0)
    row = lambda i: (i, 0)
    single = pl.Buffered(1)  # grid-invariant blocks: no double buffering

    # Explicit scoped-VMEM budget: single-buffered bf16 weights + double-
    # buffered f32 output tiles + elementwise temporaries, plus headroom.
    weight_bytes = 2 * _round_up(Kp, 16) * Np * 2      # CrT + CiT, bf16, 1 buf
    out_bytes = 2 * 2 * tb * Np * 4                    # 2 f32 outputs, 2 bufs
    tmp_bytes = 4 * tb * max(Kp, 128) * 4              # theta / er / ei / tmps
    needed = weight_bytes + out_bytes + tmp_bytes + (1 << 20)
    vmem_limit = min(max(int(needed * 1.5), 32 << 20), 100 << 20)

    cost = pl.CostEstimate(
        flops=8 * batch_pad * Kp * Np,                 # 4 real matmuls
        transcendentals=2 * batch_pad * Kp,            # cos + sin
        bytes_accessed=(weight_bytes + 4 * batch_pad + 4 * Kp
                        + 2 * batch_pad * Np * 4))

    out_re, out_im = pl.pallas_call(
        torus_rep_kernel,
        out_shape=(jax.ShapeDtypeStruct((batch_pad, Np), jnp.float32),
                   jax.ShapeDtypeStruct((batch_pad, Np), jnp.float32)),
        grid_spec=pltpu.PrefetchScalarGridSpec(
            num_scalar_prefetch=0,
            grid=grid,
            in_specs=[pl.BlockSpec((tb, 1), row),                          # t
                      pl.BlockSpec((1, Kp), const, pipeline_mode=single),  # w
                      pl.BlockSpec((Kp, Np), const, pipeline_mode=single), # Re(C)^T
                      pl.BlockSpec((Kp, Np), const, pipeline_mode=single)],# Im(C)^T
            out_specs=[pl.BlockSpec((tb, Np), row),
                       pl.BlockSpec((tb, Np), row)]),
        compiler_params=pltpu.CompilerParams(
            dimension_semantics=("parallel",),      # shards batch tiles on v7x
            vmem_limit_bytes=vmem_limit),
        cost_estimate=cost,
        # TODO(synk): for very large N (Np beyond ~2-3k), add a second grid axis
        # that column-tiles CrT/CiT so the per-step weight working set is bounded
        # and weight DMA pipelines against MXU work (needed to fit v7x's 64 MiB).
    )(t_dev, w_dev, crt, cit)

    out_re = out_re[:batch, :N]
    out_im = out_im[:batch, :N]
    return out_re + 1j * out_im      # complex64


def reference_numpy(t, A, B, omega, x0, period):
    d = x0.shape[0]
    m = omega.shape[0]
    om = (np.concatenate([omega.astype(np.float64), np.zeros(d - m)])
          if m < d else omega.astype(np.float64))
    e = np.exp(2j * np.pi * om[None, :] * t.reshape(-1, 1) / period)  # (batch, N)
    y = B @ x0                                                        # (N,)
    z = e * y[None, :]
    return z @ A.T                                                    # (batch, N)


if __name__ == "__main__":
    N, batch, m = 32, 16, 24
    period = 1.0

    key = jax.random.PRNGKey(0)
    ks = jax.random.split(key, 7)
    Ar = np.asarray(jax.random.normal(ks[0], (N, N), jnp.float32), np.float64)
    Ai = np.asarray(jax.random.normal(ks[1], (N, N), jnp.float32), np.float64)
    Br = np.asarray(jax.random.normal(ks[2], (N, N), jnp.float32), np.float64)
    Bi = np.asarray(jax.random.normal(ks[3], (N, N), jnp.float32), np.float64)
    x0r = np.asarray(jax.random.normal(ks[4], (N,), jnp.float32), np.float64)
    x0i = np.asarray(jax.random.normal(ks[5], (N,), jnp.float32), np.float64)
    t = np.asarray(jax.random.uniform(ks[6], (batch, 1), jnp.float32), np.float64)

    A = Ar + 1j * Ai
    B = Br + 1j * Bi
    x0 = x0r + 1j * x0i
    omega = np.arange(1, m + 1, dtype=np.int32)   # m < N exercises zero-padding

    out = torus_rep_forward(t, A, B, omega, x0, period)
    out = jax.block_until_ready(out)

    ref = reference_numpy(t, A, B, omega, x0, period)

    # Tolerance reflects bf16 MXU operands with f32 accumulation (no Gauss-trick
    # cancellation path anymore).
    rel_err = np.max(np.abs(np.asarray(out) - ref)) / np.max(np.abs(ref))
    assert rel_err < 2e-2, f"relative error too large: {rel_err}"
    print("KERNEL_OK")
</pallas_src>

<mosaic_0001>
module attributes {stable_mosaic.version = 11 : i64} {
  func.func @torus_rep_kernel(%arg0: i32, %arg1: memref<16x1xf32, #tpu.memory_space<vmem>>, %arg2: memref<1x32xf32, #tpu.memory_space<vmem>>, %arg3: memref<32x128xbf16, #tpu.memory_space<vmem>>, %arg4: memref<32x128xbf16, #tpu.memory_space<vmem>>, %arg5: memref<16x128xf32, #tpu.memory_space<vmem>>, %arg6: memref<16x128xf32, #tpu.memory_space<vmem>>) attributes {dimension_semantics = [#tpu.dimension_semantics<parallel>], iteration_bounds = array<i64: 1>, scalar_prefetch = 0 : i64, scratch_operands = 0 : i64, tpu.core_type = #tpu.core_type<tc>, window_params = [{transform_indices = @transform_0, window_bounds = array<i64: 16, 1>}, {pipeline_mode = #tpu.pipeline_mode<synchronous>, transform_indices = @transform_1, window_bounds = array<i64: 1, 32>}, {pipeline_mode = #tpu.pipeline_mode<synchronous>, transform_indices = @transform_2, window_bounds = array<i64: 32, 128>}, {pipeline_mode = #tpu.pipeline_mode<synchronous>, transform_indices = @transform_3, window_bounds = array<i64: 32, 128>}, {transform_indices = @transform_4, window_bounds = array<i64: 16, 128>}, {transform_indices = @transform_5, window_bounds = array<i64: 16, 128>}]} {
    %c0 = arith.constant 0 : index
    %c0_0 = arith.constant 0 : index
    %0 = vector.load %arg1[%c0, %c0_0] : memref<16x1xf32, #tpu.memory_space<vmem>>, vector<16x1xf32>
    %c0_1 = arith.constant 0 : index
    %c0_2 = arith.constant 0 : index
    %1 = vector.load %arg2[%c0_1, %c0_2] : memref<1x32xf32, #tpu.memory_space<vmem>>, vector<1x32xf32>
    %2 = vector.broadcast %0 : vector<16x1xf32> to vector<16x32xf32>
    %3 = vector.broadcast %1 : vector<1x32xf32> to vector<16x32xf32>
    %4 = arith.mulf %2, %3 : vector<16x32xf32>
    %5 = math.cos %4 : vector<16x32xf32>
    %6 = arith.truncf %5 : vector<16x32xf32> to vector<16x32xbf16>
    %7 = math.sin %4 : vector<16x32xf32>
    %8 = arith.truncf %7 : vector<16x32xf32> to vector<16x32xbf16>
    %c0_3 = arith.constant 0 : index
    %c0_4 = arith.constant 0 : index
    %9 = vector.load %arg3[%c0_3, %c0_4] : memref<32x128xbf16, #tpu.memory_space<vmem>>, vector<32x128xbf16>
    %c0_5 = arith.constant 0 : index
    %c0_6 = arith.constant 0 : index
    %10 = vector.load %arg4[%c0_5, %c0_6] : memref<32x128xbf16, #tpu.memory_space<vmem>>, vector<32x128xbf16>
    %cst = arith.constant dense<0.000000e+00> : vector<16x128xf32>
    %11 = tpu.matmul %6, %9, %cst {dimension_numbers = #tpu.dot_dimension_numbers<[1], [0], [0], [1], [0, 0, 1, 1], [], []>} : vector<16x32xbf16>, vector<32x128xbf16>, vector<16x128xf32> -> vector<16x128xf32>
    %cst_7 = arith.constant dense<0.000000e+00> : vector<16x128xf32>
    %12 = tpu.matmul %8, %10, %cst_7 {dimension_numbers = #tpu.dot_dimension_numbers<[1], [0], [0], [1], [0, 0, 1, 1], [], []>} : vector<16x32xbf16>, vector<32x128xbf16>, vector<16x128xf32> -> vector<16x128xf32>
    %13 = arith.subf %11, %12 : vector<16x128xf32>
    %c0_8 = arith.constant 0 : index
    %c0_9 = arith.constant 0 : index
    %14 = vector.load %arg5[%c0_8, %c0_9] : memref<16x128xf32, #tpu.memory_space<vmem>>, vector<16x128xf32>
    tpu.vector_store %arg5[%c0_8, %c0_9], %13 {strides = array<i32>} : memref<16x128xf32, #tpu.memory_space<vmem>>, vector<16x128xf32>,
    %cst_10 = arith.constant dense<0.000000e+00> : vector<16x128xf32>
    %15 = tpu.matmul %6, %10, %cst_10 {dimension_numbers = #tpu.dot_dimension_numbers<[1], [0], [0], [1], [0, 0, 1, 1], [], []>} : vector<16x32xbf16>, vector<32x128xbf16>, vector<16x128xf32> -> vector<16x128xf32>
    %cst_11 = arith.constant dense<0.000000e+00> : vector<16x128xf32>
    %16 = tpu.matmul %8, %9, %cst_11 {dimension_numbers = #tpu.dot_dimension_numbers<[1], [0], [0], [1], [0, 0, 1, 1], [], []>} : vector<16x32xbf16>, vector<32x128xbf16>, vector<16x128xf32> -> vector<16x128xf32>
    %17 = arith.addf %15, %16 : vector<16x128xf32>
    %c0_12 = arith.constant 0 : index
    %c0_13 = arith.constant 0 : index
    %18 = vector.load %arg6[%c0_12, %c0_13] : memref<16x128xf32, #tpu.memory_space<vmem>>, vector<16x128xf32>
    tpu.vector_store %arg6[%c0_12, %c0_13], %17 {strides = array<i32>} : memref<16x128xf32, #tpu.memory_space<vmem>>, vector<16x128xf32>,
    return
  }
  func.func @transform_0(%arg0: i32) -> (i32, i32) {
    %c0_i32 = arith.constant 0 : i32
    %c0_i32_0 = arith.constant 0 : i32
    return %arg0, %c0_i32 : i32, i32
  }
  func.func @transform_1(%arg0: i32) -> (i32, i32) {
    %c0_i32 = arith.constant 0 : i32
    %c0_i32_0 = arith.constant 0 : i32
    %c0_i32_1 = arith.constant 0 : i32
    return %c0_i32, %c0_i32_0 : i32, i32
  }
  func.func @transform_2(%arg0: i32) -> (i32, i32) {
    %c0_i32 = arith.constant 0 : i32
    %c0_i32_0 = arith.constant 0 : i32
    %c0_i32_1 = arith.constant 0 : i32
    return %c0_i32, %c0_i32_0 : i32, i32
  }
  func.func @transform_3(%arg0: i32) -> (i32, i32) {
    %c0_i32 = arith.constant 0 : i32
    %c0_i32_0 = arith.constant 0 : i32
    %c0_i32_1 = arith.constant 0 : i32
    return %c0_i32, %c0_i32_0 : i32, i32
  }
  func.func @transform_4(%arg0: i32) -> (i32, i32) {
    %c0_i32 = arith.constant 0 : i32
    %c0_i32_0 = arith.constant 0 : i32
    return %arg0, %c0_i32 : i32, i32
  }
  func.func @transform_5(%arg0: i32) -> (i32, i32) {
    %c0_i32 = arith.constant 0 : i32
    %c0_i32_0 = arith.constant 0 : i32
    return %arg0, %c0_i32 : i32, i32
  }
}

</mosaic_0001>

<bundles_post_ra>
// kernel: tpu_custom_call.1
= control target key start
LH: loop header
LB: loop body
LE: loop exit
PB: predicated region body
PF: predicated region fallthrough
CT: control target
= control target key end

     0   :  { %11 = vsyncpa [#allocation3], 0  ;;  %s1090_s0 = inlined_call_operand.vmem [shape: f32[16,1], index: 0, kind: input, shape index: {}]   ;;  %s1091_s1 = inlined_call_operand.vmem [shape: f32[1,32], index: 1, kind: input, shape index: {}]   ;;  %s1092_s2 = inlined_call_operand.vmem [shape: bf16[32,128], index: 2, kind: input, shape index: {}]   ;;  %s1093_s3 = inlined_call_operand.hbm [shape: bf16[32,128], index: 3, kind: input, shape index: {}]   ;;  %s1094_s4 = inlined_call_operand.hbm [shape: f32[16,128], index: 4, kind: output, shape index: {0}]   ;;  %s1095_s5 = inlined_call_operand.hbm [shape: f32[16,128], index: 5, kind: output, shape index: {1}]  }
   0x1   :  { %12 = vsyncpa [#allocation4], 0 }
   0x2   :  { %13 = vsyncpa [#allocation7], 0  ;;  %s897_s18 = smov [#allocation2]   ;;  %s825_s22 = scalar_lea.hbm %s1093_s3, 256 }
   0x3   :  { %s25_s19 = sshll.u32 %s897_s18, 4  ;;  %p826_p0 = scmp.ne.s32.totalorder %s1093_s3, %s825_s22  ;;  %s26_s19 = int_to_ptr.vmem [resolvable:$true] %s25_s19 }
   0x4   :  { %p829_p1 = scmp.lt.u32.totalorder %s825_s22, %s1093_s3 }
   0x6   :  { %p831_p2 = pnand %p829_p1, %p826_p0 }
   0x8   :  { %834 = shalt.err (!%p831_p2)
}
   0x9   :  { %s835_s27 = scalar_lea.vmem %s26_s19, 256  ;;  %p840_p4 = scmp.lt.s32.totalorder %s26_s19, %s26_s19 }
   0xa   :  { %p836_p3 = scmp.ne.s32.totalorder %s26_s19, %s835_s27  ;;  %p841_p5 = scmp.lt.s32.totalorder %s835_s27, %s835_s27 }
   0xc   :  { %p842_p6 = por %p841_p5, %p840_p4 }
   0xe   :  { %p843_p7 = pnand %p842_p6, %p836_p3 }
  0x10   :  { %846 = shalt.err (!%p843_p7)
}
  0x11   :  { %s898_s28 = smov 64   ;;  %s899_s29 = smov 4  }
  0x12   :  { %31 = dma.hbm_to_vmem [thread:$0]  %s1093_s3, 256, %s26_s19, [#allocation3], %s898_s28, %s898_s28, %s899_s29  }
  0x13   :  { %891 = dma.done.wait [#allocation3], 256  }
  0x14   :  { %892 = vsyncadd [#allocation3], 4294967040  ;;  %v900_v0 = vmov 0   ;;  %v36_v1 = vld [vmem:[%s1090_s0] sm:$0xff]  ;;  %v37_v2 = vld [vmem:[%s1090_s0 + $0x8] sm:$0xff]  ;;  %v901_v4 = vmov 0.0  }
  0x15   :  { %812 = vset.pattern.permute.xlu0 %v900_v0  ;;  %v813_v3 = vld [vmem:[%s1092_s2] sm:$0xff]   ;;  %768 = vmatprep.subr.bf16.mxu0 %v901_v4  ;;  %v814_v5 = vld [vmem:[%s1092_s2 + $0x8] sm:$0xff]   ;;  %vm902_vm0 = vmmov 0   ;;  %v903_v27 = vmov 683565275   ;;  %s910_s15 = smov [#allocation6]  }
  0x16   :  { %41 = vperm.xlu0 %812, %v36_v1   ;;  %752 = vmatprep.subr.bf16.mxu1 %v901_v4  ;;  %v715_v6 = vld [vmem:[%s1091_s1] ss:$0 sm:$0xff]  ;;  %v904_v31 = vmov 2475754826   ;;  %v905_v33 = vmov 2131351028  }
  0x17   :  { %769 = vmatpush3.bf16.msra.mxu0 %v813_v3  ;;  %753 = vmatpush3.bf16.msra.mxu1 %v813_v3  ;;  %v906_v35 = vmov 2102212464   ;;  %v907_v37 = vmov 920167782   ;;  %v908_v44 = vmov 1326507024  }
  0x18   :  { %770 = vmatprep.subr.bf16.mxu0 %v901_v4  ;;  %754 = vmatprep.subr.bf16.mxu1 %v901_v4  ;;  %s909_s1 = smov [#allocation5]   ;;  %s699_s16 = sshll.u32 %s910_s15, 4  ;;  %s1059_s16 = int_to_ptr.vmem [resolvable:$true] %s699_s16 }
  0x19   :  { %756 = vmatprep.mubr.msk.bf16.mxu1 %vm902_vm0, %v901_v4  ;;  %772 = vmatprep.mubr.msk.bf16.mxu0 %vm902_vm0, %v901_v4  ;;  %s687_s2 = sshll.u32 %s909_s1, 4  ;;  %s688_s2 = int_to_ptr.vmem [resolvable:$true] %s687_s2 }
  0x1a   :  { %46 = vperm.xlu0 %812, %v37_v2   ;;  %s847_s17 = scalar_lea.vmem %s688_s2, 256  ;;  %p852_p9 = scmp.lt.s32.totalorder %s688_s2, %s688_s2 }
  0x1b   :  { %771 = vmatpush3.bf16.msra.mxu0 %v814_v5  ;;  %755 = vmatpush3.bf16.msra.mxu1 %v814_v5  ;;  %p848_p8 = scmp.ne.s32.totalorder %s688_s2, %s847_s17  ;;  %p853_p10 = scmp.lt.s32.totalorder %s847_s17, %s847_s17 }
  0x1c   :  { %776 = vmatprep.subr.bf16.mxu0 %v901_v4  ;;  %760 = vmatprep.subr.bf16.mxu1 %v901_v4 }
  0x1d   :  { %p854_p11 = por %p853_p10, %p852_p9 }
  0x1f   :  { %p855_p12 = pnand %p854_p11, %p848_p8 }
  0x95   :  { %v42_v7 = vpop.permute.xlu0 %41 }
  0x96   :  { %v980_v8 = vmul.f32 %v715_v6, %v42_v7 }
  0x98   :  { %v57_v9 = vand.u32 2147483647, %v980_v8  ;;  %v60_v10 = vand.u32 2139095040, %v980_v8  ;;  %vm59_vm15 = vcmp.lt.s32.totalorder %v980_v8, 0 }
  0x99   :  { %v47_v11 = vpop.permute.xlu0 %46 }
  0x9a   :  { %v61_v12 = vshrl.u32 %v60_v10, 23  ;;  %v984_v13 = vmul.f32 %v715_v6, %v47_v11  ;;  %v64_v14 = vand.u32 8388607, %v57_v9 }
  0x9c   :  { %v716_v15 = vadd.s32 4294967169, %v61_v12  ;;  %v163_v16 = vand.u32 2139095040, %v984_v13  ;;  %v65_v18 = vor.u32 8388608, %v64_v14  ;;  %v160_v20 = vand.u32 2147483647, %v984_v13 }
  0x9e   :  { %v67_v17 = vadd.s32 1, %v716_v15  ;;  %v164_v19 = vshrl.u32 %v163_v16, 23  ;;  %v990_v25 = vshll.u32 %v65_v18, 8  ;;  %v167_v29 = vand.u32 8388607, %v160_v20 }
  0xa0   :  { %vm68_vm1 = vcmp.gt.s32.totalorder %v67_v17, 0  ;;  %v720_v22 = vadd.s32 4294967169, %v164_v19  ;;  %v168_v59 = vor.u32 8388608, %v167_v29 }
  0xa1   :  { %v69_v21 = vsel %vm68_vm1, %v67_v17, 0  ;;  %vm58_vm1 = vcmp.le.f32.partialorder %v57_v9, 0.7853982 }
  0xa2   :  { %v70_v23 = vshrl.u32 %v69_v21, 5  ;;  %v71_v24 = vand.u32 31, %v69_v21  ;;  %v170_v30 = vadd.s32 1, %v720_v22  ;;  %v208_v11 = vshll.u32 %v168_v59, 8 }
  0xa4   :  { %v72_v26 = vsub.s32 32, %v71_v24  ;;  %v74_v28 = vshll.u32 %v903_v27, %v71_v24  ;;  %v77_v32 = vshll.u32 %v904_v31, %v71_v24  ;;  %v80_v34 = vshll.u32 %v905_v33, %v71_v24 }
  0xa5   :  { %v83_v36 = vshll.u32 %v906_v35, %v71_v24  ;;  %v86_v38 = vshll.u32 %v907_v37, %v71_v24  ;;  %vm89_vm2 = vcmp.lt.s32.totalorder %v70_v23, 1  ;;  %vm91_vm3 = vcmp.lt.s32.totalorder %v70_v23, 3 }
  0xa6   :  { %v75_v39 = vshrl.u32 %v904_v31, %v72_v26  ;;  %v78_v40 = vshrl.u32 %v905_v33, %v72_v26  ;;  %v81_v41 = vshrl.u32 %v906_v35, %v72_v26  ;;  %v73_v42 = vshrl.u32 %v903_v27, %v72_v26 }
  0xa7   :  { %v84_v43 = vshrl.u32 %v907_v37, %v72_v26  ;;  %v87_v45 = vshrl.u32 %v908_v44, %v72_v26  ;;  %vm171_vm4 = vcmp.gt.s32.totalorder %v170_v30, 0  ;;  %vm92_vm5 = vcmp.lt.s32.totalorder %v70_v23, 4 }
  0xa8   :  { %v76_v46 = vor.u32 %v75_v39, %v74_v28  ;;  %v79_v47 = vor.u32 %v78_v40, %v77_v32  ;;  %v82_v48 = vor.u32 %v81_v41, %v80_v34  ;;  %v172_v51 = vsel %vm171_vm4, %v170_v30, 0 }
  0xa9   :  { %v85_v49 = vor.u32 %v84_v43, %v83_v36  ;;  %v88_v50 = vor.u32 %v87_v45, %v86_v38  ;;  %vm90_vm6 = vcmp.lt.s32.totalorder %v70_v23, 2  ;;  %v174_v62 = vand.u32 31, %v172_v51 }
  0xaa   :  { %v93_v52 = vsel %vm89_vm2, %v73_v42, %v76_v46  ;;  %v94_v53 = vsel %vm92_vm5, %v82_v48, 2102212464  ;;  %v97_v54 = vsel %vm89_vm2, %v76_v46, %v79_v47  ;;  %v101_v55 = vsel %vm89_vm2, %v79_v47, %v82_v48 }
  0xab   :  { %v95_v56 = vsel %vm91_vm3, %v79_v47, %v94_v53  ;;  %v98_v57 = vsel %vm92_vm5, %v85_v49, 920167782  ;;  %v102_v58 = vsel %vm92_vm5, %v88_v50, 1326507024  ;;  %v173_v7 = vshrl.u32 %v172_v51, 5 }
  0xac   :  { %v99_v60 = vsel %vm91_vm3, %v82_v48, %v98_v57  ;;  %v103_v61 = vsel %vm91_vm3, %v85_v49, %v102_v58  ;;  %v96_v63 = vsel %vm90_vm6, %v93_v52, %v95_v56  ;;  %v175_v10 = vsub.s32 32, %v174_v62 }
  0xad   :  { %v100_v0 = vsel %vm90_vm6, %v97_v54, %v99_v60  ;;  %v104_v1 = vsel %vm90_vm6, %v101_v55, %v103_v61  ;;  %v112_v12 = vmul.u32 %v990_v25, %v96_v63  ;;  %v177_v14 = vshll.u32 %v903_v27, %v174_v62 }
  0xae   :  { %v1003_v2 = vmul.u32.u64.low %v990_v25, %v104_v1  ;;  %v1004_v3 = vmul.u32.u64.high %v990_v25, %v104_v1, %v1003_v2  ;;  %v1007_v5 = vmul.u32.u64.low %v990_v25, %v100_v0  ;;  %v1008_v6 = vmul.u32.u64.high %v990_v25, %v100_v0, %v1007_v5 }
  0xaf   :  { %v180_v15 = vshll.u32 %v904_v31, %v174_v62  ;;  %v183_v16 = vshll.u32 %v905_v33, %v174_v62  ;;  %v178_v17 = vshrl.u32 %v904_v31, %v175_v10  ;;  %v181_v18 = vshrl.u32 %v905_v33, %v175_v10 }
  0xb0   :  { %v184_v19 = vshrl.u32 %v906_v35, %v175_v10  ;;  %v186_v21 = vshll.u32 %v906_v35, %v174_v62  ;;  %vm114_vm7 = vc.u32 %v1004_v3, %v1007_v5  ;;  %v115_v22 = vadd.s32 1, %v1008_v6 }
  0xb1   :  { %v187_v23 = vshrl.u32 %v907_v37, %v175_v10  ;;  %v189_v24 = vshll.u32 %v907_v37, %v174_v62  ;;  %v179_v26 = vor.u32 %v178_v17, %v177_v14  ;;  %v182_v28 = vor.u32 %v181_v18, %v180_v15 }
  0xb2   :  { %v185_v29 = vor.u32 %v184_v19, %v183_v16  ;;  %v190_v30 = vshrl.u32 %v908_v44, %v175_v10  ;;  %v116_v25 = vsel %vm114_vm7, %v115_v22, %v1008_v6  ;;  %vm192_vm8 = vcmp.lt.s32.totalorder %v173_v7, 1 }
  0xb3   :  { %v188_v32 = vor.u32 %v187_v23, %v186_v21  ;;  %vm195_vm9 = vcmp.lt.s32.totalorder %v173_v7, 4  ;;  %v117_v31 = vadd.s32 %v116_v25, %v112_v12  ;;  %vm194_vm10 = vcmp.lt.s32.totalorder %v173_v7, 3 }
  0xb4   :  { %v191_v33 = vor.u32 %v190_v30, %v189_v24  ;;  %v197_v34 = vsel %vm195_vm9, %v185_v29, 2102212464  ;;  %v176_v35 = vshrl.u32 %v903_v27, %v175_v10  ;;  %v200_v36 = vsel %vm192_vm8, %v179_v26, %v182_v28 }
  0xb5   :  { %v201_v38 = vsel %vm195_vm9, %v188_v32, 920167782  ;;  %v204_v39 = vsel %vm192_vm8, %v182_v28, %v185_v29  ;;  %v118_v40 = vadd.s32 536870912, %v117_v31  ;;  %vm193_vm11 = vcmp.lt.s32.totalorder %v173_v7, 2 }
  0xb6   :  { %v202_v37 = vsel %vm194_vm10, %v185_v29, %v201_v38  ;;  %v205_v41 = vsel %vm195_vm9, %v191_v33, 1326507024  ;;  %v196_v42 = vsel %vm192_vm8, %v176_v35, %v179_v26  ;;  %v198_v43 = vsel %vm194_vm10, %v182_v28, %v197_v34 }
  0xb7   :  { %v203_v44 = vsel %vm193_vm11, %v200_v36, %v202_v37  ;;  %v206_v45 = vsel %vm194_vm10, %v188_v32, %v205_v41  ;;  %v1018_v46 = vshrl.u32 %v118_v40, 30  ;;  %v199_v52 = vsel %vm193_vm11, %v196_v42, %v198_v43 }
  0xb8   :  { %v207_v47 = vsel %vm193_vm11, %v204_v39, %v206_v45  ;;  %v1020_v48 = vmul.u32.u64.low %v208_v11, %v203_v44  ;;  %v1021_v49 = vmul.u32.u64.high %v208_v11, %v203_v44, %v1020_v48  ;;  %v215_v55 = vmul.u32 %v208_v11, %v199_v52 }
  0xb9   :  { %v1023_v50 = vmul.u32.u64.low %v208_v11, %v207_v47  ;;  %v1024_v51 = vmul.u32.u64.high %v208_v11, %v207_v47, %v1023_v50  ;;  %v120_v27 = vshll.u32 %v1018_v46, 30  ;;  %v113_v6 = vadd.s32 %v1007_v5, %v1004_v3 }
  0xba   :  { %v218_v54 = vadd.s32 1, %v1021_v49  ;;  %v143_v39 = vsub.s32 4, %v1018_v46  ;;  %vm162_vm2 = vcmp.lt.s32.totalorder %v984_v13, 0  ;;  %vm161_vm3 = vcmp.le.f32.partialorder %v160_v20, 0.7853982 }
  0xbb   :  { %v121_v53 = vsub.s32 %v117_v31, %v120_v27  ;;  %vm217_vm12 = vc.u32 %v1024_v51, %v1020_v48  ;;  %v216_v29 = vadd.s32 %v1020_v48, %v1024_v51  ;;  %vm493_vm4 = vcmask 261120  }
  0xbc   :  { %v219_v57 = vsel %vm217_vm12, %v218_v54, %v1021_v49  ;;  %v144_v43 = vsel %vm59_vm15, %v143_v39, %v1018_v46 }
  0xbd   :  { %v123_v56 = vsub.s32 0, %v121_v53  ;;  %v220_v58 = vadd.s32 %v219_v57, %v215_v55  ;;  %v146_v9 = vsel %vm58_vm1, 0, %v144_v43 }
  0xbe   :  { %v357_v50 = vadd.s32 3, %v146_v9 }
  0xbf   :  { %v717_v59 = vmin.u32 %v123_v56, %v121_v53  ;;  %v221_v60 = vadd.s32 536870912, %v220_v58 }
  0xc0   :  { %v358_v46 = vand.u32 3, %v357_v50 }
  0xc1   :  { %v125_v61 = vclz %v717_v59  ;;  %v222_v62 = vshrl.u32 %v221_v60, 30 }
  0xc2   :  { %vm360_vm7 = vcmp.eq.s32.totalorder %v358_v46, 0  ;;  %vm363_vm8 = vcmp.eq.s32.totalorder %v358_v46, 2  ;;  %vm359_vm11 = vcmp.lt.s32.totalorder %v358_v46, 2 }
  0xc3   :  { %v718_v63 = vadd.s32 4294967294, %v125_v61  ;;  %v223_v0 = vshll.u32 %v222_v62, 30  ;;  %v246_v42 = vsub.s32 4, %v222_v62 }
  0xc5   :  { %vm719_vm13 = vcmp.lt.s32.totalorder %v718_v63, 0  ;;  %v224_v2 = vsub.s32 %v220_v58, %v223_v0  ;;  %v247_v47 = vsel %vm162_vm2, %v246_v42, %v222_v62 }
  0xc6   :  { %v128_v1 = vsel %vm719_vm13, 0, %v718_v63  ;;  %v249_v49 = vsel %vm161_vm3, 0, %v247_v47 }
  0xc7   :  { %v129_v7 = vsub.s32 32, %v128_v1  ;;  %v133_v10 = vsub.s32 4294967266, %v128_v1  ;;  %v226_v11 = vsub.s32 0, %v224_v2  ;;  %v130_v12 = vshll.u32 %v121_v53, %v128_v1 }
  0xc8   :  { %v461_v52 = vadd.s32 3, %v249_v49  ;;  %v150_v53 = vand.u32 3, %v146_v9  ;;  %v253_v56 = vand.u32 3, %v249_v49 }
  0xc9   :  { %v131_v14 = vshrl.u32 %v113_v6, %v129_v7  ;;  %v134_v15 = vadd.s32 127, %v133_v10  ;;  %v721_v16 = vmin.u32 %v226_v11, %v224_v2 }
  0xca   :  { %v462_v57 = vand.u32 3, %v461_v52  ;;  %vm152_vm5 = vcmp.eq.s32.totalorder %v150_v53, 0  ;;  %vm155_vm6 = vcmp.eq.s32.totalorder %v150_v53, 2  ;;  %vm151_vm9 = vcmp.lt.s32.totalorder %v150_v53, 2 }
  0xcb   :  { %v132_v17 = vor.u32 %v131_v14, %v130_v12  ;;  %v135_v18 = vshll.u32 %v134_v15, 23  ;;  %v228_v19 = vclz %v721_v16  ;;  %vm255_vm10 = vcmp.eq.s32.totalorder %v253_v56, 0 }
  0xcc   :  { %vm258_vm12 = vcmp.eq.s32.totalorder %v253_v56, 2  ;;  %vm464_vm13 = vcmp.eq.s32.totalorder %v462_v57, 0 }
  0xcd   :  { %v136_v21 = vor.u32 4788187, %v135_v18  ;;  %v722_v22 = vadd.s32 4294967294, %v228_v19  ;;  %v139_v24 = vcvt.s32.f32 %v132_v17  ;;  %v815_v19 = vld [vmem:[#allocation2] sm:$0xff]  }
  0xcf   :  { %v137_v23 = vand.u32 2147483647, %v136_v21  ;;  %vm723_vm14 = vcmp.lt.s32.totalorder %v722_v22, 0 }
  0xd0   :  { %v231_v28 = vsel %vm723_vm14, 0, %v722_v22  ;;  %vm467_vm14 = vcmp.eq.s32.totalorder %v462_v57, 2 }
  0xd1   :  { %v140_v26 = vmul.f32 %v139_v24, %v137_v23  ;;  %v232_v3 = vsub.s32 32, %v231_v28  ;;  %v236_v5 = vsub.s32 4294967266, %v231_v28  ;;  %v233_v25 = vshll.u32 %v224_v2, %v231_v28  ;;  %v816_v23 = vld [vmem:[#allocation2 + $0x8] sm:$0xff]  }
  0xd3   :  { %v141_v30 = vxor.u32 2147483648, %v140_v26  ;;  %v234_v32 = vshrl.u32 %v216_v29, %v232_v3  ;;  %v237_v31 = vadd.s32 127, %v236_v5 }
  0xd5   :  { %v142_v33 = vsel %vm59_vm15, %v141_v30, %v140_v26  ;;  %v235_v34 = vor.u32 %v234_v32, %v233_v25  ;;  %v238_v35 = vshll.u32 %v237_v31, 23  ;;  %vm254_vm15 = vcmp.lt.s32.totalorder %v253_v56, 2 }
  0xd6   :  { %v145_v36 = vsel %vm58_vm1, %v980_v8, %v142_v33  ;;  %vm463_vm1 = vcmp.lt.s32.totalorder %v462_v57, 2 }
  0xd7   :  { %v239_v38 = vor.u32 4788187, %v238_v35  ;;  %817 = vcosq.f32 %v145_v36  ;;  %v242_v37 = vcvt.s32.f32 %v235_v34 }
  0xd8   :  { %819 = vsinq.f32 %v145_v36 }
  0xd9   :  { %v240_v40 = vand.u32 2147483647, %v239_v38 }
  0xdb   :  { %v243_v41 = vmul.f32 %v242_v37, %v240_v40 }
  0xdd   :  { %v244_v44 = vxor.u32 2147483648, %v243_v41 }
  0xdf   :  { %v245_v45 = vsel %vm162_vm2, %v244_v44, %v243_v41  ;;  %vm149_vm2 = vweird.f32 %v980_v8 }
  0xe0   :  { %v248_v48 = vsel %vm161_vm3, %v984_v13, %v245_v45  ;;  %vm252_vm3 = vweird.f32 %v984_v13 }
  0xe1   :  { %821 = vcosq.f32 %v248_v48  ;;  %v818_v51 = vpop.eup %817 }
  0xe2   :  { %823 = vsinq.f32 %v248_v48  ;;  %v820_v27 = vpop.eup %819  ;;  %v156_v55 = vxor.u32 2147483648, %v818_v51 }
  0xe3   :  { %v153_v54 = vxor.u32 2147483648, %v820_v27 }
  0xe4   :  { %v157_v59 = vsel %vm155_vm6, %v156_v55, %v820_v27  ;;  %v365_v61 = vsel %vm363_vm8, %v156_v55, %v820_v27 }
  0xe5   :  { %v154_v58 = vsel %vm152_vm5, %v818_v51, %v153_v54  ;;  %v362_v60 = vsel %vm360_vm7, %v818_v51, %v153_v54 }
  0xe6   :  { %v158_v1 = vsel %vm151_vm9, %v154_v58, %v157_v59  ;;  %v366_v6 = vsel %vm359_vm11, %v362_v60, %v365_v61 }
  0xe7   :  { %v159_v15 = vsel %vm149_vm2, nan, %v158_v1  ;;  %v367_v17 = vsel %vm149_vm2, nan, %v366_v6 }
  0xeb   :  { %v822_v20 = vpop.eup %821 }
  0xec   :  { %v824_v62 = vpop.eup %823  ;;  %v259_v63 = vxor.u32 2147483648, %v822_v20 }
  0xed   :  { %v256_v0 = vxor.u32 2147483648, %v824_v62 }
  0xee   :  { %v260_v2 = vsel %vm258_vm12, %v259_v63, %v824_v62  ;;  %v469_v7 = vsel %vm467_vm14, %v259_v63, %v824_v62 }
  0xef   :  { %v257_v10 = vsel %vm255_vm10, %v822_v20, %v256_v0  ;;  %v466_v11 = vsel %vm464_vm13, %v822_v20, %v256_v0 }
  0xf0   :  { %v261_v12 = vsel %vm254_vm15, %v257_v10, %v260_v2  ;;  %v470_v14 = vsel %vm463_vm1, %v466_v11, %v469_v7 }
  0xf1   :  { %v262_v16 = vsel %vm252_vm3, nan, %v261_v12  ;;  %v471_v18 = vsel %vm252_vm3, nan, %v470_v14 }
  0xf2   :  { %v263_v21 = vpack.c.bf16 %v262_v16, %v159_v15  ;;  %v472_v22 = vpack.c.bf16 %v471_v18, %v367_v17 }
  0xf4   :  { %757 = vmatmul.mubr.msk.bf16.vlgmr.msra.gmra.mrb[0].mxu1 %vm493_vm4, %v263_v21  ;;  %773 = vmatmul.mubr.msk.bf16.vlgmr.msra.gmra.mrb[0].mxu0 %vm493_vm4, %v472_v22 }
  0xf5   :  { %777 = vmatpush3.bf16.msra.mxu0 %v815_v19  ;;  %761 = vmatpush3.bf16.msra.mxu1 %v815_v19 }
  0xf6   :  { %762 = vmatprep.subr.bf16.mxu1 %v901_v4  ;;  %778 = vmatprep.subr.bf16.mxu0 %v901_v4 }
  0xf7   :  { %764 = vmatprep.mubr.msk.bf16.mxu1 %vm902_vm0, %v901_v4  ;;  %780 = vmatprep.mubr.msk.bf16.mxu0 %vm902_vm0, %v901_v4 }
  0xf9   :  { %763 = vmatpush3.bf16.msra.mxu1 %v816_v23  ;;  %779 = vmatpush3.bf16.msra.mxu0 %v816_v23 }
  0xfc   :  { %765 = vmatmul.mubr.msk.bf16.vlgmr.msra.gmra.mrb[4].mxu1 %vm493_vm4, %v472_v22 }
 0x100   :  { %781 = vmatmul.mubr.msk.bf16.vlgmr.msra.gmra.mrb[0].mxu0 %vm493_vm4, %v263_v21 }
 0x1c7   :  { %v531_v8 = vpop.f32.mrb[0].mxu1 }
 0x1c8   :  { %v758_v13 = vpop.f32.mrb[1].mxu1 }
 0x1c9   :  { %v534_v24 = vpop.f32.mrb[2].mxu1 }
 0x1ca   :  { %v759_v26 = vpop.f32.mrb[3].mxu1 }
 0x1cf   :  { %v587_v28 = vpop.f32.mrb[4].mxu1 }
 0x1d0   :  { %v594_v29 = vsub.f32 %v531_v8, %v587_v28  ;;  %v766_v3 = vpop.f32.mrb[5].mxu1 }
 0x1d1   :  { %v590_v5 = vpop.f32.mrb[6].mxu1 }
 0x1d2   :  { %596 = vst [vmem:[#allocation5] sm:$0xff] %v594_v29  ;;  %v595_v4 = vsub.f32 %v534_v24, %v590_v5  ;;  %v767_v30 = vpop.f32.mrb[7].mxu1 }
 0x1d3   :  { %v673_v25 = vpop.f32.mrb[0].mxu0 }
 0x1d4   :  { %597 = vst [vmem:[#allocation5 + $0x8] sm:$0xff] %v595_v4  ;;  %680 = vst [vmem:[#allocation6] sm:$0xff] %v673_v25  ;;  %v782_v32 = vpop.f32.mrb[1].mxu0 }
 0x1d5   :  { %v676_v31 = vpop.f32.mrb[2].mxu0 }
 0x1d6   :  { %858 = shalt.err (!%p855_p12)
}
 0x1d7   :  { %s859_s20 = scalar_lea.hbm %s1094_s4, 256 }
 0x1d8   :  { %p860_p13 = scmp.ne.s32.totalorder %s1094_s4, %s859_s20  ;;  %p863_p0 = scmp.lt.u32.totalorder %s859_s20, %s1094_s4 }
 0x1da   :  { %p865_p1 = pnand %p863_p0, %p860_p13 }
 0x1dc   :  { %868 = shalt.err (!%p865_p1)
}
 0x1dd   :  { %s911_s25 = smov 128   ;;  %s912_s26 = smov 8   ;;  %681 = vst [vmem:[#allocation6 + $0x8] sm:$0xff] %v676_v31  ;;  %v783_v33 = vpop.f32.mrb[3].mxu0 }
 0x1de   :  { %693 = dma.vmem_to_hbm [thread:$0]  %s688_s2, 256, %s1094_s4, [#allocation4], %s911_s25, %s911_s25, %s912_s26  }
 0x1df   :  { %s869_s29 = scalar_lea.vmem %s1059_s16, 256  ;;  %p874_p3 = scmp.lt.s32.totalorder %s1059_s16, %s1059_s16 }
 0x1e0   :  { %p870_p2 = scmp.ne.s32.totalorder %s1059_s16, %s869_s29  ;;  %p875_p4 = scmp.lt.s32.totalorder %s869_s29, %s869_s29 }
 0x1e2   :  { %p876_p5 = por %p875_p4, %p874_p3 }
 0x1e4   :  { %p877_p6 = pnand %p876_p5, %p870_p2 }
 0x1e6   :  { %880 = shalt.err (!%p877_p6)
}
 0x1e7   :  { %s881_s7 = scalar_lea.hbm %s1095_s5, 256 }
 0x1e8   :  { %p882_p7 = scmp.ne.s32.totalorder %s1095_s5, %s881_s7  ;;  %p885_p8 = scmp.lt.u32.totalorder %s881_s7, %s1095_s5 }
 0x1ea   :  { %p887_p9 = pnand %p885_p8, %p882_p7 }
 0x1ec   :  { %890 = shalt.err (!%p887_p9)
}
 0x1ed   :  { %705 = dma.vmem_to_hbm [thread:$0]  %s1059_s16, 256, %s1095_s5, [#allocation7], %s911_s25, %s911_s25, %s912_s26  }
 0x1ee   :  { %893 = dma.done.wait [#allocation4], 256  }
 0x1ef   :  { %894 = vsyncadd [#allocation4], 4294967040 }
 0x1f0   :  { %895 = dma.done.wait [#allocation7], 256  }
 0x1f1   :  { %896 = vsyncadd [#allocation7], 4294967040 }
 0x1f2   :  { %712 = vsyncpa [#allocation3], 1 }
 0x1f3   :  { %713 = vsyncpa [#allocation4], 1 }
 0x1f4   :  { %714 = vsyncpa [#allocation7], 1 }

</bundles_post_ra>
